<compile_context>
chip_gen: v6e
topology: v6e:2x2x1
jax: 0.10.0
libtpu: 0.0.40
codegen_flags: <defaults>
</compile_context>

<pallas_src>
import functools

import jax
import jax.numpy as jnp
from jax import lax
from jax.experimental import pallas as pl
from jax.experimental.pallas import tpu as pltpu


def _round_up(a: int, b: int) -> int:
    return pl.cdiv(a, b) * b


def _innerprod_kernel(state_ref, x_ref, out_ref, *, normalize: bool, valid_m: int):
    # (tile_n, H_pad) x (M_pad, H_pad) contracted over H -> (tile_n, M_pad).
    # NT-form dot_general: no transposed copy of x is materialized.
    score = lax.dot_general(
        state_ref[...],
        x_ref[...],
        dimension_numbers=(((1,), (1,)), ((), ())),
        preferred_element_type=jnp.float32,
    )

    if normalize:
        m_pad = score.shape[-1]
        if valid_m < m_pad:
            # Padded columns must not participate in the softmax.
            col = lax.broadcasted_iota(jnp.int32, score.shape, 1)
            score = jnp.where(col < valid_m, score, -jnp.inf)
        # Numerically stable log_softmax over the last (full-M) axis.
        mx = jnp.max(score, axis=-1, keepdims=True)
        shifted = score - mx
        lse = jnp.log(jnp.sum(jnp.exp(shifted), axis=-1, keepdims=True))
        score = shifted - lse

    out_ref[...] = score.astype(out_ref.dtype)


def innerprod_step_score(state, x, *, step_score_normalize: bool):
    """state: (N, H), x: (M, H) -> score: (N, M) float32."""
    N, H = state.shape
    M, Hx = x.shape
    assert H == Hx, "hidden dims must match"

    compute_dtype = jnp.float32  # keep f32 inputs; MXU accumulates in f32.

    # Lane-dense padding: last dims multiples of 128 (unmasked vst / full vregs).
    H_pad = _round_up(H, 128)
    M_pad = _round_up(M, 128)

    # Pick the N tile: multiple of 8 (sublane), as large as a conservative VMEM
    # budget allows (sized against v7x's smaller scoped VMEM, with headroom for
    # double-buffered inputs + output).
    vmem_budget = 24 * 1024 * 1024  # bytes, conservative
    bytes_per = jnp.dtype(compute_dtype).itemsize
    tile_n = min(512, _round_up(N, 8))
    while tile_n > 8:
        need = 2 * bytes_per * (tile_n * H_pad + M_pad * H_pad + tile_n * M_pad)
        if need <= vmem_budget:
            break
        tile_n //= 2
    tile_n = max(tile_n, 8)

    N_pad = _round_up(N, tile_n)

    state_p = jnp.pad(
        state.astype(compute_dtype), ((0, N_pad - N), (0, H_pad - H))
    )
    x_p = jnp.pad(x.astype(compute_dtype), ((0, M_pad - M), (0, H_pad - H)))

    kernel = functools.partial(
        _innerprod_kernel, normalize=step_score_normalize, valid_m=M
    )

    cost = pl.CostEstimate(
        flops=2 * N_pad * M_pad * H_pad,
        transcendentals=(2 * N_pad * M_pad) if step_score_normalize else 0,
        bytes_accessed=bytes_per
        * (N_pad * H_pad + M_pad * H_pad + N_pad * M_pad),
    )

    out_padded = pl.pallas_call(
        kernel,
        out_shape=jax.ShapeDtypeStruct((N_pad, M_pad), jnp.float32),
        grid_spec=pltpu.PrefetchScalarGridSpec(
            num_scalar_prefetch=0,
            grid=(N_pad // tile_n,),
            in_specs=[
                # state: tiled over N, full (padded) H per block.
                pl.BlockSpec((tile_n, H_pad), lambda i: (i, 0)),
                # x: full (padded) array resident each step (constant block).
                pl.BlockSpec((M_pad, H_pad), lambda i: (0, 0)),
            ],
            # Output keeps the full M extent per block -> log_softmax is local.
            out_specs=pl.BlockSpec((tile_n, M_pad), lambda i: (i, 0)),
        ),
        compiler_params=pltpu.CompilerParams(
            dimension_semantics=("parallel",),
            vmem_limit_bytes=64 * 1024 * 1024,
        ),
        cost_estimate=cost,
    )(state_p, x_p)

    return out_padded[:N, :M]


def _reference(state, x, step_score_normalize):
    score = state.astype(jnp.float32) @ x.astype(jnp.float32).T
    if step_score_normalize:
        score = jax.nn.log_softmax(score, axis=-1)
    return score


if __name__ == "__main__":
    key = jax.random.PRNGKey(0)
    k1, k2 = jax.random.split(key)

    # Small shapes consistent with the module: N "states" x hidden, M "values" x hidden.
    N, M, H = 8, 16, 32
    state = jax.random.normal(k1, (N, H), dtype=jnp.float32)
    x = jax.random.normal(k2, (M, H), dtype=jnp.float32)

    # Run both variants of the module (step_score_normalize = False / True).
    out_plain = innerprod_step_score(state, x, step_score_normalize=False)
    out_norm = innerprod_step_score(state, x, step_score_normalize=True)
    jax.block_until_ready(out_plain)
    jax.block_until_ready(out_norm)

    ref_plain = _reference(state, x, False)
    ref_norm = _reference(state, x, True)

    assert out_plain.shape == (N, M) and out_norm.shape == (N, M)
    assert jnp.allclose(out_plain, ref_plain, atol=1e-5, rtol=1e-5)
    assert jnp.allclose(out_norm, ref_norm, atol=1e-5, rtol=1e-5)

    print("KERNEL_OK")
</pallas_src>

<mosaic_0001>
module attributes {stable_mosaic.version = 11 : i64} {
  func.func @_innerprod_kernel(%arg0: i32, %arg1: memref<8x128xf32, #tpu.memory_space<vmem>>, %arg2: memref<128x128xf32, #tpu.memory_space<vmem>>, %arg3: memref<8x128xf32, #tpu.memory_space<vmem>>) attributes {dimension_semantics = [#tpu.dimension_semantics<parallel>], iteration_bounds = array<i64: 1>, scalar_prefetch = 0 : i64, scratch_operands = 0 : i64, tpu.core_type = #tpu.core_type<tc>, window_params = [{transform_indices = @transform_0, window_bounds = array<i64: 8, 128>}, {pipeline_mode = #tpu.pipeline_mode<synchronous>, transform_indices = @transform_1, window_bounds = array<i64: 128, 128>}, {transform_indices = @transform_2, window_bounds = array<i64: 8, 128>}]} {
    %c0 = arith.constant 0 : index
    %c0_0 = arith.constant 0 : index
    %0 = vector.load %arg1[%c0, %c0_0] : memref<8x128xf32, #tpu.memory_space<vmem>>, vector<8x128xf32>
    %c0_1 = arith.constant 0 : index
    %c0_2 = arith.constant 0 : index
    %1 = vector.load %arg2[%c0_1, %c0_2] : memref<128x128xf32, #tpu.memory_space<vmem>>, vector<128x128xf32>
    %cst = arith.constant dense<0.000000e+00> : vector<8x128xf32>
    %2 = tpu.matmul %0, %1, %cst {dimension_numbers = #tpu.dot_dimension_numbers<[1], [1], [0], [0], [0, 0, 1, 0], [], []>} : vector<8x128xf32>, vector<128x128xf32>, vector<8x128xf32> -> vector<8x128xf32>
    %c0_3 = arith.constant 0 : index
    %c0_4 = arith.constant 0 : index
    %3 = vector.load %arg3[%c0_3, %c0_4] : memref<8x128xf32, #tpu.memory_space<vmem>>, vector<8x128xf32>
    tpu.vector_store %arg3[%c0_3, %c0_4], %2 {strides = array<i32>} : memref<8x128xf32, #tpu.memory_space<vmem>>, vector<8x128xf32>,
    return
  }
  func.func @transform_0(%arg0: i32) -> (i32, i32) {
    %c0_i32 = arith.constant 0 : i32
    %c0_i32_0 = arith.constant 0 : i32
    return %arg0, %c0_i32 : i32, i32
  }
  func.func @transform_1(%arg0: i32) -> (i32, i32) {
    %c0_i32 = arith.constant 0 : i32
    %c0_i32_0 = arith.constant 0 : i32
    %c0_i32_1 = arith.constant 0 : i32
    return %c0_i32, %c0_i32_0 : i32, i32
  }
  func.func @transform_2(%arg0: i32) -> (i32, i32) {
    %c0_i32 = arith.constant 0 : i32
    %c0_i32_0 = arith.constant 0 : i32
    return %arg0, %c0_i32 : i32, i32
  }
}

</mosaic_0001>

<bundles_post_ra>
// kernel: tpu_custom_call.1
= control target key start
LH: loop header
LB: loop body
LE: loop exit
PB: predicated region body
PF: predicated region fallthrough
CT: control target
= control target key end

     0   :  { %7 = vsyncpa [#allocation3], 0  ;;  %s298_s0 = inlined_call_operand.hbm [shape: f32[8,128], index: 0, kind: input, shape index: {}]   ;;  %s299_s1 = inlined_call_operand.hbm [shape: f32[128,128], index: 1, kind: input, shape index: {}]   ;;  %s300_s2 = inlined_call_operand.hbm [shape: f32[8,128], index: 2, kind: output, shape index: {}]  }
   0x1   :  { %8 = vsyncpa [#allocation6], 0 }
   0x2   :  { %9 = vsyncpa [#allocation4], 0  ;;  %s267_s9 = smov [#allocation2]   ;;  %s268_s11 = smov [#allocation5]  }
   0x3   :  { %s16_s10 = sshll.u32 %s267_s9, 4  ;;  %s25_s12 = sshll.u32 %s268_s11, 4  ;;  %s17_s10 = int_to_ptr.vmem [resolvable:$true] %s16_s10  ;;  %s26_s12 = int_to_ptr.vmem [resolvable:$true] %s25_s12 }
   0x4   :  { %s209_s13 = scalar_lea.vmem %s17_s10, 128  ;;  %p214_p1 = scmp.lt.s32.totalorder %s17_s10, %s17_s10 }
   0x5   :  { %p210_p0 = scmp.ne.s32.totalorder %s17_s10, %s209_s13  ;;  %p215_p2 = scmp.lt.s32.totalorder %s209_s13, %s209_s13 }
   0x7   :  { %p216_p3 = por %p215_p2, %p214_p1 }
   0x9   :  { %p217_p4 = pnand %p216_p3, %p210_p0 }
   0xb   :  { %220 = shalt.err (!%p217_p4)
}
   0xc   :  { %19 = dma.hbm_to_vmem [thread:$0]  %s298_s0, 128, %s17_s10, [#allocation3]  }
   0xd   :  { %s229_s16 = scalar_lea.vmem %s26_s12, 2048  ;;  %p234_p6 = scmp.lt.s32.totalorder %s26_s12, %s26_s12 }
   0xe   :  { %p230_p5 = scmp.ne.s32.totalorder %s26_s12, %s229_s16  ;;  %p235_p7 = scmp.lt.s32.totalorder %s229_s16, %s229_s16 }
  0x10   :  { %p236_p8 = por %p235_p7, %p234_p6 }
  0x12   :  { %p237_p9 = pnand %p236_p8, %p230_p5 }
  0x14   :  { %240 = shalt.err (!%p237_p9)
}
  0x15   :  { %s269_s17 = smov 128   ;;  %s270_s18 = smov 8  }
  0x16   :  { %31 = dma.hbm_to_vmem [thread:$0]  %s299_s1, 2048, %s26_s12, [#allocation6], %s269_s17, %s269_s17, %s270_s18  }
  0x17   :  { %261 = dma.done.wait [#allocation3], 128  }
  0x18   :  { %262 = vsyncadd [#allocation3], 4294967168 }
  0x19   :  { %263 = dma.done.wait [#allocation6], 2048  }
  0x1a   :  { %264 = vsyncadd [#allocation6], 4294965248  ;;  %v271_v0 = vmov 0.0   ;;  %vm272_vm0 = vmmov 0   ;;  %v54_v1 = vld [vmem:[#allocation5 + $0x78] sm:$0xff]  ;;  %v53_v2 = vld [vmem:[#allocation5 + $0x70] sm:$0xff] }
  0x1b   :  { %159 = vmatprep.subr.mxu0 %v271_v0  ;;  %191 = vmatprep.mubr.msk.f32.mxu0 %vm272_vm0, %v271_v0  ;;  %v52_v3 = vld [vmem:[#allocation5 + $0x68] sm:$0xff]  ;;  %v51_v4 = vld [vmem:[#allocation5 + $0x60] sm:$0xff]  ;;  %v50_v5 = vld [vmem:[#allocation5 + $0x58] sm:$0xff]  ;;  %s273_s0 = smov [#allocation7]  }
  0x1c   :  { %160 = vmatpush3.xpose.msra.mxu0 %v54_v1  ;;  %v49_v6 = vld [vmem:[#allocation5 + $0x50] sm:$0xff]  ;;  %v48_v7 = vld [vmem:[#allocation5 + $0x48] sm:$0xff]  ;;  %v47_v8 = vld [vmem:[#allocation5 + $0x40] sm:$0xff]  ;;  %s132_s1 = sshll.u32 %s273_s0, 4  ;;  %s133_s1 = int_to_ptr.vmem [resolvable:$true] %s132_s1 }
  0x1d   :  { %161 = vmatprep.subr.mxu0 %v271_v0  ;;  %v46_v9 = vld [vmem:[#allocation5 + $0x38] sm:$0xff]  ;;  %v45_v10 = vld [vmem:[#allocation5 + $0x30] sm:$0xff]  ;;  %v44_v11 = vld [vmem:[#allocation5 + $0x28] sm:$0xff]  ;;  %s241_s21 = scalar_lea.vmem %s133_s1, 128  ;;  %p246_p11 = scmp.lt.s32.totalorder %s133_s1, %s133_s1 }
  0x1e   :  { %v43_v12 = vld [vmem:[#allocation5 + $0x20] sm:$0xff]  ;;  %v42_v13 = vld [vmem:[#allocation5 + $0x18] sm:$0xff]  ;;  %v41_v14 = vld [vmem:[#allocation5 + $0x10] sm:$0xff]  ;;  %p242_p10 = scmp.ne.s32.totalorder %s133_s1, %s241_s21  ;;  %p247_p12 = scmp.lt.s32.totalorder %s241_s21, %s241_s21 }
  0x1f   :  { %v40_v15 = vld [vmem:[#allocation5 + $0x8] sm:$0xff]  ;;  %v39_v16 = vld [vmem:[#allocation5] sm:$0xff]  ;;  %v38_v17 = vld [vmem:[#allocation2] sm:$0xff] }
  0x20   :  { %162 = vmatpush3.xpose.msra.mxu0 %v53_v2  ;;  %p248_p13 = por %p247_p12, %p246_p11 }
  0x21   :  { %163 = vmatprep.subr.mxu0 %v271_v0 }
  0x22   :  { %p249_p0 = pnand %p248_p13, %p242_p10 }
  0x24   :  { %164 = vmatpush3.xpose.msra.mxu0 %v52_v3 }
  0x25   :  { %165 = vmatprep.subr.mxu0 %v271_v0 }
  0x28   :  { %166 = vmatpush3.xpose.msra.mxu0 %v51_v4 }
  0x29   :  { %167 = vmatprep.subr.mxu0 %v271_v0 }
  0x2c   :  { %168 = vmatpush3.xpose.msra.mxu0 %v50_v5 }
  0x2d   :  { %169 = vmatprep.subr.mxu0 %v271_v0 }
  0x30   :  { %170 = vmatpush3.xpose.msra.mxu0 %v49_v6 }
  0x31   :  { %171 = vmatprep.subr.mxu0 %v271_v0 }
  0x34   :  { %172 = vmatpush3.xpose.msra.mxu0 %v48_v7 }
  0x35   :  { %173 = vmatprep.subr.mxu0 %v271_v0 }
  0x38   :  { %174 = vmatpush3.xpose.msra.mxu0 %v47_v8 }
  0x39   :  { %175 = vmatprep.subr.mxu0 %v271_v0 }
  0x3c   :  { %176 = vmatpush3.xpose.msra.mxu0 %v46_v9 }
  0x3d   :  { %177 = vmatprep.subr.mxu0 %v271_v0 }
  0x40   :  { %178 = vmatpush3.xpose.msra.mxu0 %v45_v10 }
  0x41   :  { %179 = vmatprep.subr.mxu0 %v271_v0 }
  0x44   :  { %180 = vmatpush3.xpose.msra.mxu0 %v44_v11 }
  0x45   :  { %181 = vmatprep.subr.mxu0 %v271_v0 }
  0x48   :  { %182 = vmatpush3.xpose.msra.mxu0 %v43_v12 }
  0x49   :  { %183 = vmatprep.subr.mxu0 %v271_v0 }
  0x4c   :  { %184 = vmatpush3.xpose.msra.mxu0 %v42_v13 }
  0x4d   :  { %185 = vmatprep.subr.mxu0 %v271_v0 }
  0x50   :  { %186 = vmatpush3.xpose.msra.mxu0 %v41_v14 }
  0x51   :  { %187 = vmatprep.subr.mxu0 %v271_v0 }
  0x54   :  { %188 = vmatpush3.xpose.msra.mxu0 %v40_v15 }
  0x55   :  { %189 = vmatprep.subr.mxu0 %v271_v0 }
  0x58   :  { %190 = vmatpush3.xpose.msra.mxu0 %v39_v16 }
  0x5b   :  { %192 = vmatmul.mubr.f32.vlgmr.msra.gmra.mxu0 %v38_v17 }
 0x11b   :  { %v121_v18 = vpop.f32.mrf.mxu0 }
 0x11c   :  { %125 = vst [vmem:[#allocation7] sm:$0xff] %v121_v18 }
 0x11d   :  { %v193_v19 = vpop.f32.mrf.mxu0 }
 0x11e   :  { %252 = shalt.err (!%p249_p0)
}
 0x11f   :  { %135 = dma.vmem_to_hbm [thread:$0]  %s133_s1, 128, %s300_s2, [#allocation4]  }
 0x120   :  { %265 = dma.done.wait [#allocation4], 128  }
 0x121   :  { %266 = vsyncadd [#allocation4], 4294967168 }
 0x122   :  { %139 = vsyncpa [#allocation3], 1 }
 0x123   :  { %140 = vsyncpa [#allocation6], 1 }
 0x124   :  { %141 = vsyncpa [#allocation4], 1 }

</bundles_post_ra>
